<compile_context>
chip_gen: v7x
topology: tpu7x:2x2x1
jax: 0.10.0
libtpu: 0.0.40
codegen_flags: <defaults>
</compile_context>

<pallas_src>
import functools
import math

import jax
import jax.numpy as jnp
from jax.experimental import pallas as pl
from jax.experimental.pallas import tpu as pltpu


# ----------------------------------------------------------------------------
# Single-step cell kernel (matches RNN.forward exactly)
# ----------------------------------------------------------------------------
def _rnn_cell_kernel(input_size, hidden_size, output_size,
                     x_ref, h_ref, w_ref, b_ref, out_ref, hid_ref):
    """y = [x|h] @ W_fused + b ; hid = y[:, :H] ; out = log_softmax(y[:, H:H+O])."""
    w = w_ref[...]
    y = (jnp.dot(x_ref[...], w[:input_size, :], preferred_element_type=jnp.float32)
         + jnp.dot(h_ref[...], w[input_size:, :], preferred_element_type=jnp.float32)
         + b_ref[...])

    hid = y[:, :hidden_size]
    logits = y[:, hidden_size:hidden_size + output_size]

    # Numerically stable log-softmax over the lane axis (exp/log hit the EUP).
    m = jnp.max(logits, axis=1, keepdims=True)
    shifted = logits - m
    lse = jnp.log(jnp.sum(jnp.exp(shifted), axis=1, keepdims=True))

    hid_ref[...] = hid
    out_ref[...] = shifted - lse


def rnn_cell_forward(x, h, w_fused, b_fused, hidden_size, output_size):
    """One RNN step.

    x: (B, input_size) f32, h: (B, hidden_size) f32
    w_fused: (input_size + hidden_size, N_pad)  (pre-fused + lane-padded)
    b_fused: (1, N_pad)
    Returns (log_softmax_output (B, output_size), new_hidden (B, hidden_size)).
    """
    B, input_size = x.shape

    vmem = pl.BlockSpec(memory_space=pltpu.MemorySpace.VMEM)
    out, hid = pl.pallas_call(
        functools.partial(_rnn_cell_kernel, input_size, hidden_size, output_size),
        out_shape=(
            jax.ShapeDtypeStruct((B, output_size), jnp.float32),
            jax.ShapeDtypeStruct((B, hidden_size), jnp.float32),
        ),
        in_specs=[vmem, vmem, vmem, vmem],
        out_specs=(vmem, vmem),
    )(x, h, w_fused, b_fused)
    return out, hid


# ----------------------------------------------------------------------------
# Sequence kernel: Tc timesteps per grid step, weights resident in VMEM,
# hidden state carried in the (VMEM-resident) final-hidden output block.
# ----------------------------------------------------------------------------
def _rnn_seq_kernel(input_size, hidden_size, output_size, t_chunk, t_total, t_pad,
                    x_ref, h0_ref, w_ref, b_ref, out_ref, hfin_ref):
    c = pl.program_id(1)  # time-chunk index (inner, sequential axis)

    @pl.when(c == 0)
    def _():
        hfin_ref[...] = h0_ref[...]

    w = w_ref[...]
    w_x = w[:input_size, :]
    w_h = w[input_size:, :]
    b = b_ref[...]

    h = hfin_ref[...]  # carried hidden state (VMEM-resident output block)
    for tc in range(t_chunk):  # statically unrolled over the chunk
        x = x_ref[tc]  # (Bb, input_size)
        y = (jnp.dot(x, w_x, preferred_element_type=jnp.float32)
             + jnp.dot(h, w_h, preferred_element_type=jnp.float32)
             + b)
        new_h = y[:, :hidden_size]
        logits = y[:, hidden_size:hidden_size + output_size]

        m = jnp.max(logits, axis=1, keepdims=True)
        shifted = logits - m
        lse = jnp.log(jnp.sum(jnp.exp(shifted), axis=1, keepdims=True))

        # Per-step write lands in the resident VMEM output block; the HBM
        # writeback is one lane-dense (Bb, Tc*O) store per chunk.
        out_ref[:, tc * output_size:(tc + 1) * output_size] = shifted - lse

        # Only the last chunk can contain padded (invalid) timesteps; mask the
        # hidden-state carry there so the final hidden matches T real steps.
        if (t_pad - t_chunk) + tc >= t_total:
            valid = ((c * t_chunk + tc) < t_total).astype(jnp.float32)
            h = new_h * valid + h * (1.0 - valid)
        else:
            h = new_h

    hfin_ref[...] = h


def rnn_sequence_forward(xs, h0, w_fused, b_fused, hidden_size, output_size,
                         *, t_chunk=None, b_block=None):
    """Run the RNN cell over a whole sequence inside ONE pallas_call.

    xs: (T, B, input_size), h0: (B, hidden_size)
    Returns (log_probs (T, B, output_size), final_hidden (B, hidden_size)).
    """
    T, B, input_size = xs.shape
    H, O = hidden_size, output_size
    n_pad = w_fused.shape[1]

    if t_chunk is None:
        # Pick Tc so the per-chunk log-prob writeback is >= 128 lanes wide.
        t_chunk = max(1, pl.cdiv(128, O))
    Tc = t_chunk
    n_chunks = pl.cdiv(T, Tc)
    T_pad = n_chunks * Tc
    if T_pad != T:
        xs = jnp.pad(xs, ((0, T_pad - T), (0, 0), (0, 0)))

    if b_block is None:
        b_block = B
    Bb = b_block
    assert B % Bb == 0, "batch must be divisible by the batch block"
    n_bb = B // Bb

    kernel = functools.partial(_rnn_seq_kernel, input_size, H, O, Tc, T, T_pad)

    out_chunks, h_final = pl.pallas_call(
        kernel,
        out_shape=(
            jax.ShapeDtypeStruct((n_chunks, B, Tc * O), jnp.float32),
            jax.ShapeDtypeStruct((B, H), jnp.float32),
        ),
        grid=(n_bb, n_chunks),
        in_specs=[
            # per-chunk input block of Tc timesteps
            pl.BlockSpec((Tc, Bb, input_size), lambda bb, c: (c, bb, 0)),
            # initial hidden for this batch block
            pl.BlockSpec((Bb, H), lambda bb, c: (bb, 0)),
            # weights / bias: constant blocks -> resident in VMEM across the grid
            pl.BlockSpec(w_fused.shape, lambda bb, c: (0, 0)),
            pl.BlockSpec((1, n_pad), lambda bb, c: (0, 0)),
        ],
        out_specs=(
            # lane-dense per-chunk log-prob slab
            pl.BlockSpec((None, Bb, Tc * O), lambda bb, c: (c, bb, 0)),
            # final hidden: constant along time axis -> acts as the carry buffer
            pl.BlockSpec((Bb, H), lambda bb, c: (bb, 0)),
        ),
        compiler_params=pltpu.CompilerParams(
            dimension_semantics=("parallel", "arbitrary")),
    )(xs, h0, w_fused, b_fused)

    # (n_chunks, B, Tc*O) -> (T, B, O): pure layout plumbing in the wrapper.
    log_probs = (out_chunks.reshape(n_chunks, B, Tc, O)
                 .transpose(0, 2, 1, 3)
                 .reshape(T_pad, B, O)[:T])
    return log_probs, h_final


# ----------------------------------------------------------------------------
# Parameter handling
# ----------------------------------------------------------------------------
def prepare_params(w_i2h, b_i2h, w_i2o, b_i2o, lane=128):
    """Transpose / fuse / lane-pad ONCE (not per forward call).

    PyTorch layout: w_i2h (H, I+H), w_i2o (O, I+H)  ->  W_fused (I+H, N_pad) with
    column layout [ hid (H) | logits (O) | zero pad ], b_fused (1, N_pad), so the
    kernels compute  [x|h] @ W_fused + b_fused  on full-lane vregs.
    """
    n = w_i2h.shape[0] + w_i2o.shape[0]                       # H + O
    n_pad = max(lane, pl.cdiv(n, lane) * lane)
    w = jnp.concatenate([w_i2h, w_i2o], axis=0).T.astype(jnp.float32)   # (I+H, H+O)
    b = jnp.concatenate([b_i2h, b_i2o]).reshape(1, -1).astype(jnp.float32)
    w = jnp.pad(w, ((0, 0), (0, n_pad - n)))
    b = jnp.pad(b, ((0, 0), (0, n_pad - n)))
    return w, b


def init_params(key, input_size, hidden_size, output_size):
    """Deterministic init mimicking nn.Linear's uniform(-1/sqrt(fan_in), +...)."""
    k1, k2, k3, k4 = jax.random.split(key, 4)
    fan_in = input_size + hidden_size
    bound = 1.0 / math.sqrt(fan_in)
    w_i2h = jax.random.uniform(k1, (hidden_size, fan_in), jnp.float32, -bound, bound)
    b_i2h = jax.random.uniform(k2, (hidden_size,), jnp.float32, -bound, bound)
    w_i2o = jax.random.uniform(k3, (output_size, fan_in), jnp.float32, -bound, bound)
    b_i2o = jax.random.uniform(k4, (output_size,), jnp.float32, -bound, bound)
    return w_i2h, b_i2h, w_i2o, b_i2o


if __name__ == "__main__":
    input_size, hidden_size, output_size = 16, 32, 8
    batch = 8          # >= 8 so all f32 sublanes / MXU rows are actually used
    seq_len = 20       # exercises the padded-tail masking (Tc=16 -> 2 chunks)

    key = jax.random.PRNGKey(0)
    kx, ks, kp = jax.random.split(key, 3)

    x = jax.random.normal(kx, (batch, input_size), jnp.float32)
    xs = jax.random.normal(ks, (seq_len, batch, input_size), jnp.float32)
    h0 = jnp.zeros((batch, hidden_size), jnp.float32)   # initHidden() -> zeros

    w_i2h, b_i2h, w_i2o, b_i2o = init_params(kp, input_size, hidden_size, output_size)
    w_fused, b_fused = prepare_params(w_i2h, b_i2h, w_i2o, b_i2o)   # once, not per step

    # ---- single step (== RNN.forward) ----
    out, h1 = rnn_cell_forward(x, h0, w_fused, b_fused, hidden_size, output_size)
    jax.block_until_ready((out, h1))

    combined = jnp.concatenate([x, h0], axis=1)
    hid_ref = combined @ w_i2h.T + b_i2h
    out_ref = jax.nn.log_softmax(combined @ w_i2o.T + b_i2o, axis=1)
    assert jnp.allclose(out, out_ref, atol=1e-5, rtol=1e-5), "cell output mismatch"
    assert jnp.allclose(h1, hid_ref, atol=1e-5, rtol=1e-5), "cell hidden mismatch"

    # ---- pure-JAX sequence reference ----
    h = h0
    ref_outs = []
    for t in range(seq_len):
        c = jnp.concatenate([xs[t], h], axis=1)
        ref_outs.append(jax.nn.log_softmax(c @ w_i2o.T + b_i2o, axis=1))
        h = c @ w_i2h.T + b_i2h
    ref_outs = jnp.stack(ref_outs)
    ref_hT = h

    # ---- full sequence, default chunking (lane-dense Tc*O = 128) ----
    outs, hT = rnn_sequence_forward(xs, h0, w_fused, b_fused,
                                    hidden_size, output_size)
    jax.block_until_ready((outs, hT))
    assert jnp.allclose(outs, ref_outs, atol=1e-4, rtol=1e-4), "seq output mismatch"
    assert jnp.allclose(hT, ref_hT, atol=1e-4, rtol=1e-4), "seq final hidden mismatch"

    # ---- full sequence, explicit chunk size (no-padding path) ----
    outs2, hT2 = rnn_sequence_forward(xs, h0, w_fused, b_fused,
                                      hidden_size, output_size, t_chunk=5)
    jax.block_until_ready((outs2, hT2))
    assert jnp.allclose(outs2, ref_outs, atol=1e-4, rtol=1e-4), "chunked output mismatch"
    assert jnp.allclose(hT2, ref_hT, atol=1e-4, rtol=1e-4), "chunked hidden mismatch"

    print("KERNEL_OK")
</pallas_src>

<mosaic_0001>
module attributes {stable_mosaic.version = 11 : i64} {
  func.func @_rnn_cell_kernel(%arg0: memref<8x16xf32, #tpu.memory_space<vmem>>, %arg1: memref<8x32xf32, #tpu.memory_space<vmem>>, %arg2: memref<48x128xf32, #tpu.memory_space<vmem>>, %arg3: memref<1x128xf32, #tpu.memory_space<vmem>>, %arg4: memref<8x8xf32, #tpu.memory_space<vmem>>, %arg5: memref<8x32xf32, #tpu.memory_space<vmem>>) attributes {dimension_semantics = [], scalar_prefetch = 0 : i64, scratch_operands = 0 : i64, tpu.core_type = #tpu.core_type<tc>} {
    %c0 = arith.constant 0 : index
    %c0_0 = arith.constant 0 : index
    %0 = vector.load %arg2[%c0, %c0_0] : memref<48x128xf32, #tpu.memory_space<vmem>>, vector<48x128xf32>
    %c0_1 = arith.constant 0 : index
    %c0_2 = arith.constant 0 : index
    %1 = vector.load %arg0[%c0_1, %c0_2] : memref<8x16xf32, #tpu.memory_space<vmem>>, vector<8x16xf32>
    %2 = vector.extract_strided_slice %0 {offsets = [0, 0], sizes = [16, 128], strides = [1, 1]} : vector<48x128xf32> to vector<16x128xf32>
    %cst = arith.constant dense<0.000000e+00> : vector<8x128xf32>
    %3 = tpu.matmul %1, %2, %cst {dimension_numbers = #tpu.dot_dimension_numbers<[1], [0], [0], [1], [0, 0, 1, 1], [], []>} : vector<8x16xf32>, vector<16x128xf32>, vector<8x128xf32> -> vector<8x128xf32>
    %c0_3 = arith.constant 0 : index
    %c0_4 = arith.constant 0 : index
    %4 = vector.load %arg1[%c0_3, %c0_4] : memref<8x32xf32, #tpu.memory_space<vmem>>, vector<8x32xf32>
    %5 = vector.extract_strided_slice %0 {offsets = [16, 0], sizes = [32, 128], strides = [1, 1]} : vector<48x128xf32> to vector<32x128xf32>
    %cst_5 = arith.constant dense<0.000000e+00> : vector<8x128xf32>
    %6 = tpu.matmul %4, %5, %cst_5 {dimension_numbers = #tpu.dot_dimension_numbers<[1], [0], [0], [1], [0, 0, 1, 1], [], []>} : vector<8x32xf32>, vector<32x128xf32>, vector<8x128xf32> -> vector<8x128xf32>
    %7 = arith.addf %3, %6 : vector<8x128xf32>
    %c0_6 = arith.constant 0 : index
    %c0_7 = arith.constant 0 : index
    %8 = vector.load %arg3[%c0_6, %c0_7] : memref<1x128xf32, #tpu.memory_space<vmem>>, vector<1x128xf32>
    %9 = vector.broadcast %8 : vector<1x128xf32> to vector<8x128xf32>
    %10 = arith.addf %7, %9 : vector<8x128xf32>
    %11 = vector.extract_strided_slice %10 {offsets = [0, 0], sizes = [8, 32], strides = [1, 1]} : vector<8x128xf32> to vector<8x32xf32>
    %12 = vector.extract_strided_slice %10 {offsets = [0, 32], sizes = [8, 8], strides = [1, 1]} : vector<8x128xf32> to vector<8x8xf32>
    %cst_8 = arith.constant dense<0xFF800000> : vector<8xf32>
    %13 = vector.multi_reduction <maximumf>, %12, %cst_8 [1] : vector<8x8xf32> to vector<8xf32>
    %14 = vector.shape_cast %13 : vector<8xf32> to vector<8x1xf32>
    %15 = vector.broadcast %14 : vector<8x1xf32> to vector<8x8xf32>
    %16 = arith.subf %12, %15 : vector<8x8xf32>
    %17 = math.exp %16 : vector<8x8xf32>
    %cst_9 = arith.constant dense<0.000000e+00> : vector<8xf32>
    %18 = vector.multi_reduction <add>, %17, %cst_9 [1] : vector<8x8xf32> to vector<8xf32>
    %19 = vector.shape_cast %18 : vector<8xf32> to vector<8x1xf32>
    %20 = math.log %19 : vector<8x1xf32>
    %c0_10 = arith.constant 0 : index
    %c0_11 = arith.constant 0 : index
    %21 = vector.load %arg5[%c0_10, %c0_11] : memref<8x32xf32, #tpu.memory_space<vmem>>, vector<8x32xf32>
    tpu.vector_store %arg5[%c0_10, %c0_11], %11 {strides = array<i32>} : memref<8x32xf32, #tpu.memory_space<vmem>>, vector<8x32xf32>,
    %22 = vector.broadcast %20 : vector<8x1xf32> to vector<8x8xf32>
    %23 = arith.subf %16, %22 : vector<8x8xf32>
    %c0_12 = arith.constant 0 : index
    %c0_13 = arith.constant 0 : index
    %24 = vector.load %arg4[%c0_12, %c0_13] : memref<8x8xf32, #tpu.memory_space<vmem>>, vector<8x8xf32>
    tpu.vector_store %arg4[%c0_12, %c0_13], %23 {strides = array<i32>} : memref<8x8xf32, #tpu.memory_space<vmem>>, vector<8x8xf32>,
    return
  }
}

</mosaic_0001>

<bundles_post_ra>
// kernel: tpu_custom_call.1
= control target key start
LH: loop header
LB: loop body
LE: loop exit
PB: predicated region body
PF: predicated region fallthrough
CT: control target
= control target key end

     0   :  { %11 = vsyncpa [#allocation3], 0  ;;  %s553_s0 = inlined_call_operand.hbm [shape: f32[8,16], index: 0, kind: input, shape index: {}]   ;;  %s554_s1 = inlined_call_operand.hbm [shape: f32[8,32], index: 1, kind: input, shape index: {}]   ;;  %s555_s2 = inlined_call_operand.hbm [shape: f32[48,128], index: 2, kind: input, shape index: {}]   ;;  %s556_s3 = inlined_call_operand.vmem [shape: f32[1,128], index: 3, kind: input, shape index: {}]   ;;  %s557_s4 = inlined_call_operand.hbm [shape: f32[8,8], index: 4, kind: output, shape index: {0}]   ;;  %s558_s5 = inlined_call_operand.hbm [shape: f32[8,32], index: 5, kind: output, shape index: {1}]  }
   0x1   :  { %12 = vsyncpa [#allocation6], 0 }
   0x2   :  { %13 = vsyncpa [#allocation4], 0 }
   0x3   :  { %14 = vsyncpa [#allocation10], 0  ;;  %s447_s18 = smov [#allocation5]   ;;  %s448_s20 = smov [#allocation2]  }
   0x4   :  { %s31_s19 = sshll.u32 %s447_s18, 4  ;;  %s21_s21 = sshll.u32 %s448_s20, 4  ;;  %s32_s19 = int_to_ptr.vmem [resolvable:$true] %s31_s19  ;;  %s22_s21 = int_to_ptr.vmem [resolvable:$true] %s21_s21 }
   0x5   :  { %s329_s24 = scalar_lea.hbm %s554_s1, 128 }
   0x6   :  { %p330_p0 = scmp.ne.s32.totalorder %s554_s1, %s329_s24  ;;  %p333_p1 = scmp.lt.u32.totalorder %s329_s24, %s554_s1 }
   0x8   :  { %p335_p2 = pnand %p333_p1, %p330_p0 }
   0xa   :  { %338 = shalt.err (!%p335_p2)
}
   0xb   :  { %s339_s29 = scalar_lea.vmem %s32_s19, 128  ;;  %p344_p4 = scmp.lt.s32.totalorder %s32_s19, %s32_s19 }
   0xc   :  { %p340_p3 = scmp.ne.s32.totalorder %s32_s19, %s339_s29  ;;  %p345_p5 = scmp.lt.s32.totalorder %s339_s29, %s339_s29 }
   0xe   :  { %p346_p6 = por %p345_p5, %p344_p4 }
  0x10   :  { %p347_p7 = pnand %p346_p6, %p340_p3 }
  0x12   :  { %350 = shalt.err (!%p347_p7)
}
  0x13   :  { %34 = dma.hbm_to_vmem [thread:$0]  %s554_s1, 128, %s32_s19, [#allocation6]  }
  0x14   :  { %s351_s9 = scalar_lea.hbm %s553_s0, 128 }
  0x15   :  { %p352_p8 = scmp.ne.s32.totalorder %s553_s0, %s351_s9  ;;  %p355_p9 = scmp.lt.u32.totalorder %s351_s9, %s553_s0 }
  0x17   :  { %p357_p10 = pnand %p355_p9, %p352_p8 }
  0x19   :  { %360 = shalt.err (!%p357_p10)
}
  0x1a   :  { %s361_s14 = scalar_lea.vmem %s22_s21, 128  ;;  %p366_p12 = scmp.lt.s32.totalorder %s22_s21, %s22_s21 }
  0x1b   :  { %p362_p11 = scmp.ne.s32.totalorder %s22_s21, %s361_s14  ;;  %p367_p13 = scmp.lt.s32.totalorder %s361_s14, %s361_s14 }
  0x1d   :  { %p368_p0 = por %p367_p13, %p366_p12 }
  0x1f   :  { %p369_p1 = pnand %p368_p0, %p362_p11 }
  0x21   :  { %372 = shalt.err (!%p369_p1)
}
  0x22   :  { %24 = dma.hbm_to_vmem [thread:$0]  %s553_s0, 128, %s22_s21, [#allocation3]  }
  0x23   :  { %s449_s16 = smov [#allocation7]   ;;  %s373_s20 = scalar_lea.hbm %s555_s2, 768 }
  0x24   :  { %s40_s17 = sshll.u32 %s449_s16, 4  ;;  %p374_p2 = scmp.ne.s32.totalorder %s555_s2, %s373_s20  ;;  %s41_s17 = int_to_ptr.vmem [resolvable:$true] %s40_s17 }
  0x25   :  { %p377_p3 = scmp.lt.u32.totalorder %s373_s20, %s555_s2 }
  0x27   :  { %p379_p4 = pnand %p377_p3, %p374_p2 }
  0x29   :  { %382 = shalt.err (!%p379_p4)
}
  0x2a   :  { %s383_s26 = scalar_lea.vmem %s41_s17, 768  ;;  %p388_p6 = scmp.lt.s32.totalorder %s41_s17, %s41_s17 }
  0x2b   :  { %p384_p5 = scmp.ne.s32.totalorder %s41_s17, %s383_s26  ;;  %p389_p7 = scmp.lt.s32.totalorder %s383_s26, %s383_s26 }
  0x2d   :  { %p390_p8 = por %p389_p7, %p388_p6 }
  0x2f   :  { %p391_p9 = pnand %p390_p8, %p384_p5 }
  0x31   :  { %394 = shalt.err (!%p391_p9)
}
  0x32   :  { %s450_s0 = smov 128   ;;  %s451_s21 = smov 8  }
  0x33   :  { %46 = dma.hbm_to_vmem [thread:$0]  %s555_s2, 768, %s41_s17, [#allocation6], %s450_s0, %s450_s0, %s451_s21  }
  0x34   :  { %439 = dma.done.wait [#allocation3], 128  }
  0x35   :  { %440 = vsyncadd [#allocation3], 4294967168 }
  0x36   :  { %441 = dma.done.wait [#allocation6], 896  }
  0x37   :  { %442 = vsyncadd [#allocation6], 4294966400  ;;  %v452_v0 = vmov 0.0|0.0   ;;  %vm453_vm0 = vmmov 0   ;;  %v454_v1 = vmov 0.0   ;;  %v60_v2 = vld [vmem:[#allocation7 + $0x10] sm:$0xff] }
  0x38   :  { %305 = vmatprep.subr.bf16.mxu0 %v452_v0  ;;  %311 = vmatprep.subr.bf16.mxu1 %v452_v0  ;;  %v61_v3 = vld [vmem:[#allocation7 + $0x18] sm:$0xff]  ;;  %v58_v4 = vld [vmem:[#allocation7] sm:$0xff]  ;;  %v59_v6 = vld [vmem:[#allocation7 + $0x8] sm:$0xff]  ;;  %vm140_vm1 = vcmask 130048   ;;  %vm66_vm2 = vcmask 261120   ;;  %vm222_vm3 = vcmask 326912  }
  0x39   :  { %302 = vmatprep.mubr.msk.f32.mxu1 %vm453_vm0, %v454_v1  ;;  %295 = vmatprep.mubr.msk.f32.mxu0 %vm453_vm0, %v454_v1  ;;  %v306_v5 = vpack.c.bf16 %v61_v3, %v60_v2  ;;  %v62_v7 = vld [vmem:[#allocation7 + $0x20] sm:$0xff]  ;;  %v63_v8 = vld [vmem:[#allocation7 + $0x28] sm:$0xff]  ;;  %v312_v9 = vpack.c.bf16 %v59_v6, %v58_v4  ;;  %v64_v11 = vld [vmem:[#allocation2] sm:$0xff]  ;;  %s455_s30 = smov 96   ;;  %vm233_vm4 = vcmask 64512  }
  0x3a   :  { %v309_v10 = vpack.c.bf16 %v63_v8, %v62_v7  ;;  %v65_v12 = vld [vmem:[#allocation5] sm:$0xff]  ;;  %v278_v16 = vld [vmem:[%s556_s3] ss:$0 sm:$0xff]  ;;  %s456_s3 = smov [#allocation9]  }
  0x3b   :  { %307 = vmatpush3.bf16.msra.mxu0 %v306_v5  ;;  %313 = vmatpush3.bf16.msra.mxu1 %v312_v9  ;;  %s262_s6 = sshll.u32 %s456_s3, 4  ;;  %s263_s6 = int_to_ptr.vmem [resolvable:$true] %s262_s6 }
  0x3c   :  { %308 = vmatprep.subr.bf16.mxu0 %v452_v0  ;;  %s395_s7 = scalar_lea.vmem %s263_s6, 128  ;;  %p400_p11 = scmp.lt.s32.totalorder %s263_s6, %s263_s6 }
  0x3d   :  { %p396_p10 = scmp.ne.s32.totalorder %s263_s6, %s395_s7  ;;  %p401_p12 = scmp.lt.s32.totalorder %s395_s7, %s395_s7 }
  0x3e   :  { %303 = vmatmul.mubr.msk.f32.vlgmr.msra.gmra.mrb[0].mxu1 %vm140_vm1, %v64_v11 }
  0x3f   :  { %310 = vmatpush3.bf16.msra.mxu0 %v309_v10  ;;  %p402_p13 = por %p401_p12, %p400_p11 }
  0x41   :  { %p403_p0 = pnand %p402_p13, %p396_p10 }
  0x42   :  { %296 = vmatmul.mubr.msk.f32.vlgmr.msra.gmra.mrb[0].mxu0 %vm66_vm2, %v65_v12 }
 0x111   :  { %v210_v13 = vpop.f32.mrb[0].mxu1 }
 0x112   :  { %v304_v14 = vpop.f32.mrb[1].mxu1 }
 0x115   :  { %v136_v15 = vpop.f32.mrb[0].mxu0 }
 0x116   :  { %v211_v17 = vadd.f32 %v210_v13, %v136_v15  ;;  %v297_v18 = vpop.f32.mrb[1].mxu0 }
 0x118   :  { %v221_v19 = vadd.f32 %v278_v16, %v211_v17 }
 0x11a   :  { %239 = vst.msk [vmem:[#allocation9] sm:$0xff] %vm66_vm2, %v221_v19  ;;  %v223_v20 = vsel %vm222_vm3, %v221_v19, -inf }
 0x11b   :  { %224 = vmax.xlane.f32.xlu0 %v223_v20 }
 0x1a8   :  { %v225_v21 = vpop.xlane.xlu0 %224 }
 0x1a9   :  { %v226_v22 = vsub.f32 %v221_v19, %v225_v21 }
 0x1ab   :  { %v227_v23 = vmul.f32 1.442695, %v226_v22 }
 0x1ad   :  { %325 = vpow2.f32 %v227_v23 }
 0x1b7   :  { %v326_v24 = vpop.eup %325 }
 0x1b8   :  { %230 = vrot.lane.b32.xlu0 %v326_v24, %s455_s30 }
 0x22a   :  { %v231_v25 = vpop.permute.xlu0 %230 }
 0x22b   :  { %v234_v26 = vsel %vm233_vm4, %v231_v25, 0.0 }
 0x22c   :  { %235 = vadd.xlane.f32.xlu1 %v234_v26 }
 0x2b9   :  { %v236_v27 = vpop.xlane.xlu1 %235 }
 0x2ba   :  { %327 = vlog2.f32 %v236_v27 }
 0x2bb   :  { %406 = shalt.err (!%p403_p0)
}
 0x2bc   :  { %s407_s10 = scalar_lea.hbm %s558_s5, 128 }
 0x2bd   :  { %p408_p1 = scmp.ne.s32.totalorder %s558_s5, %s407_s10  ;;  %p411_p2 = scmp.lt.u32.totalorder %s407_s10, %s558_s5 }
 0x2bf   :  { %p413_p3 = pnand %p411_p2, %p408_p1 }
 0x2c1   :  { %416 = shalt.err (!%p413_p3)
}
 0x2c2   :  { %265 = dma.vmem_to_hbm [thread:$0]  %s263_s6, 128, %s558_s5, [#allocation10]  }
 0x2c3   :  { %s457_s16 = smov [#allocation8]  }
 0x2c4   :  { %v328_v28 = vpop.eup %327  ;;  %s252_s17 = sshll.u32 %s457_s16, 4  ;;  %s253_s17 = int_to_ptr.vmem [resolvable:$true] %s252_s17 }
 0x2c5   :  { %v238_v29 = vmul.f32 0.6931472, %v328_v28  ;;  %s417_s18 = scalar_lea.vmem %s253_s17, 128  ;;  %p422_p5 = scmp.lt.s32.totalorder %s253_s17, %s253_s17 }
 0x2c6   :  { %p418_p4 = scmp.ne.s32.totalorder %s253_s17, %s417_s18  ;;  %p423_p6 = scmp.lt.s32.totalorder %s417_s18, %s417_s18 }
 0x2c7   :  { %v240_v30 = vsub.f32 %v226_v22, %v238_v29 }
 0x2c8   :  { %p424_p7 = por %p423_p6, %p422_p5 }
 0x2c9   :  { %242 = vrot.lane.b32.xlu1 %v240_v30, %s455_s30 }
 0x2ca   :  { %p425_p8 = pnand %p424_p7, %p418_p4 }
 0x33b   :  { %v243_v31 = vpop.permute.xlu1 %242 }
 0x33c   :  { %245 = vst.msk [vmem:[#allocation8] sm:$0xff] %vm233_vm4, %v243_v31 }
 0x33d   :  { %428 = shalt.err (!%p425_p8)
}
 0x33e   :  { %s429_s5 = scalar_lea.hbm %s557_s4, 128 }
 0x33f   :  { %p430_p9 = scmp.ne.s32.totalorder %s557_s4, %s429_s5  ;;  %p433_p10 = scmp.lt.u32.totalorder %s429_s5, %s557_s4 }
 0x341   :  { %p435_p11 = pnand %p433_p10, %p430_p9 }
 0x343   :  { %438 = shalt.err (!%p435_p11)
}
 0x344   :  { %255 = dma.vmem_to_hbm [thread:$0]  %s253_s17, 128, %s557_s4, [#allocation4]  }
 0x345   :  { %443 = dma.done.wait [#allocation4], 128  }
 0x346   :  { %444 = vsyncadd [#allocation4], 4294967168 }
 0x347   :  { %445 = dma.done.wait [#allocation10], 128  }
 0x348   :  { %446 = vsyncadd [#allocation10], 4294967168 }
 0x349   :  { %272 = vsyncpa [#allocation3], 1 }
 0x34a   :  { %273 = vsyncpa [#allocation6], 1 }
 0x34b   :  { %274 = vsyncpa [#allocation4], 1 }
 0x34c   :  { %275 = vsyncpa [#allocation10], 1 }

</bundles_post_ra>
